<compile_context>
chip_gen: v6e
topology: v6e:2x2x1
jax: 0.10.0
libtpu: 0.0.40
codegen_flags: <defaults>
</compile_context>

<pallas_src>
import functools

import jax
import jax.numpy as jnp
from jax.experimental import pallas as pl
from jax.experimental.pallas import tpu as pltpu

BN_EPS = 0.001

_FUSED_VMEM_BUDGET = 8 << 20    # use the single fused kernel below this working set
_PASS1_VMEM_BUDGET = 20 << 20   # per-step working-set target for the tiled matmul pass
_PASS2_VMEM_BUDGET = 24 << 20   # per-step working-set target for the BN+ReLU pass


def _round_up(x, m):
    return (x + m - 1) // m * m


def _vmem_limit(nbytes):
    # Default scoped VMEM is only 16 MiB (v5e) / 32 MiB (v6e/v7x); request what the tile
    # working set actually needs (with headroom), staying well under v7x's 64 MiB physical.
    return int(min(max(int(nbytes * 1.5) + (2 << 20), 16 << 20), 40 << 20))


# ---------------------------------------------------------------------------
# Kernels
# ---------------------------------------------------------------------------

def fused_kernel(x_ref, w_ref, g_ref, b_ref, o_ref, *, n_rows):
    """Whole problem resident: matmul + exact batch stats + BN fold + ReLU, one kernel."""
    y = jnp.dot(x_ref[...].astype(jnp.bfloat16), w_ref[...],
                preferred_element_type=jnp.float32)              # (M_p, C_p) f32
    inv_n = 1.0 / n_rows
    mean = jnp.sum(y, axis=0, keepdims=True) * inv_n             # (1, C_p)
    # Exact centered variance; zero-padded rows are masked out of the centered sum.
    row = jax.lax.broadcasted_iota(jnp.int32, y.shape, 0)
    yc = jnp.where(row < n_rows, y - mean, 0.0)
    var = jnp.sum(yc * yc, axis=0, keepdims=True) * inv_n
    scale = g_ref[...] * jax.lax.rsqrt(var + BN_EPS)             # (1, C_p)
    shift = b_ref[...] - mean * scale
    o_ref[...] = jnp.maximum(y * scale + shift, 0.0).astype(o_ref.dtype)


def matmul_stats_kernel(x_ref, w_ref, y_ref, sum_ref, sq_ref):
    # x: (tm, K_p) f32  -> cast to bf16 in-kernel (VPU work hidden under MXU/DMA)
    # w: (K_p, tn) bf16    y: (tm, tn) bf16 pre-BN activations (halves HBM traffic)
    # sum/sq: (1, 1, tn) f32 per-tile partial channel stats, reduced from the f32
    #         accumulator BEFORE the bf16 cast, written directly (no concatenate).
    y = jnp.dot(x_ref[...].astype(jnp.bfloat16), w_ref[...],
                preferred_element_type=jnp.float32)
    y_ref[...] = y.astype(y_ref.dtype)
    sum_ref[0] = jnp.sum(y, axis=0, keepdims=True)
    sq_ref[0] = jnp.sum(y * y, axis=0, keepdims=True)


def bn_relu_kernel(y_ref, scale_ref, shift_ref, o_ref):
    # Folded BN + ReLU: o = max(y * scale + shift, 0)
    o_ref[...] = jnp.maximum(
        y_ref[...].astype(jnp.float32) * scale_ref[...] + shift_ref[...], 0.0
    ).astype(o_ref.dtype)


# ---------------------------------------------------------------------------
# Host-side wrappers
# ---------------------------------------------------------------------------

def prepare_weight(weight):
    """Hoistable weight prep: transpose + pad to lane-dense (K_p, C_p) + bf16 cast.
    Call once and reuse across linear_bn_relu_prepared calls."""
    out_dim, in_dim = weight.shape
    k_p = _round_up(in_dim, 128)   # NOTE: 256-rounding only pays off when compute-bound
    c_p = _round_up(out_dim, 128)
    return jnp.zeros((k_p, c_p), jnp.bfloat16).at[:in_dim, :out_dim].set(
        weight.T.astype(jnp.bfloat16))


@functools.partial(jax.jit, static_argnames=("out_dim", "tile_m"))
def linear_bn_relu_prepared(x, wb, gamma, beta, *, out_dim, tile_m=512):
    """x: (N, in_dim) f32; wb: prepare_weight(weight); gamma/beta: (out_dim,) f32."""
    n, in_dim = x.shape
    k_p, c_p = wb.shape

    gamma_p = jnp.zeros((c_p,), jnp.float32).at[:out_dim].set(gamma.astype(jnp.float32))
    beta_p = jnp.zeros((c_p,), jnp.float32).at[:out_dim].set(beta.astype(jnp.float32))

    def pad_x(m_target):
        if (n, in_dim) == (m_target, k_p):
            return x                       # no extra HBM pass over x when already aligned
        return jnp.zeros((m_target, k_p), x.dtype).at[:n, :in_dim].set(x)

    # ------------------- fused single-kernel fast path -------------------
    m_f = _round_up(n, 8)
    fused_bytes = 2 * (m_f * k_p * 4 + k_p * c_p * 2 + 2 * m_f * c_p * 4)
    if fused_bytes <= _FUSED_VMEM_BUDGET:
        out_p = pl.pallas_call(
            functools.partial(fused_kernel, n_rows=n),
            out_shape=jax.ShapeDtypeStruct((m_f, c_p), x.dtype),
            grid=(1,),
            in_specs=[
                pl.BlockSpec((m_f, k_p), lambda i: (0, 0)),
                pl.BlockSpec((k_p, c_p), lambda i: (0, 0)),
                pl.BlockSpec((1, c_p), lambda i: (0, 0)),
                pl.BlockSpec((1, c_p), lambda i: (0, 0)),
            ],
            out_specs=pl.BlockSpec((m_f, c_p), lambda i: (0, 0)),
            compiler_params=pltpu.CompilerParams(
                dimension_semantics=("arbitrary",),
                vmem_limit_bytes=_vmem_limit(fused_bytes)),
        )(pad_x(m_f), wb, gamma_p.reshape(1, c_p), beta_p.reshape(1, c_p))
        return out_p[:n, :out_dim]

    # ------------------------ tiled two-pass path ------------------------
    # Output-column tiling: only keep the whole bf16 weight resident when it comfortably
    # fits VMEM (double-buffer counted); otherwise stream (K_p, tn) column blocks (v7x).
    if 2 * k_p * c_p * 2 <= 8 << 20:
        tn = c_p
    else:
        tn = 512 if c_p % 512 == 0 else (256 if c_p % 256 == 0 else 128)
    num_n = c_p // tn

    def pass1_bytes(tm_):
        return (2 * tm_ * k_p * 4      # double-buffered f32 x tile
                + 2 * k_p * tn * 2     # weight block (counted double-buffered)
                + 2 * tm_ * tn * 2     # bf16 y tile
                + 4 * tn * 4 * 2)      # partial stats

    # Pick tm to (a) fit the VMEM budget, (b) minimize M padding, and (c) give >= 2
    # parallel M steps when the batch is big enough (feeds both v7x TensorCores).
    tm = min(tile_m, _round_up(n, 8))
    while tm > 8 and pass1_bytes(tm) > _PASS1_VMEM_BUDGET:
        tm = _round_up(tm // 2, 8)
    num_m = pl.cdiv(n, tm)
    if num_m == 1 and n >= 256:
        num_m = 2
    tm = _round_up(pl.cdiv(n, num_m), 8)
    m_p = tm * num_m

    # TODO(synk): for extremely large K add an "arbitrary" K grid axis with an f32
    # accumulator scratch instead of shrinking tm (not needed for typical MLP widths).

    y, sums, sqs = pl.pallas_call(
        matmul_stats_kernel,
        out_shape=(
            jax.ShapeDtypeStruct((m_p, c_p), jnp.bfloat16),
            jax.ShapeDtypeStruct((num_m, 1, c_p), jnp.float32),
            jax.ShapeDtypeStruct((num_m, 1, c_p), jnp.float32),
        ),
        grid=(num_m, num_n),
        in_specs=[
            pl.BlockSpec((tm, k_p), lambda i, j: (i, 0)),
            # Constant block index when num_n == 1 -> fetched once (resident weight).
            pl.BlockSpec((k_p, tn), lambda i, j: (0, j)),
        ],
        out_specs=(
            pl.BlockSpec((tm, tn), lambda i, j: (i, j)),
            pl.BlockSpec((1, 1, tn), lambda i, j: (i, 0, j)),
            pl.BlockSpec((1, 1, tn), lambda i, j: (i, 0, j)),
        ),
        compiler_params=pltpu.CompilerParams(
            dimension_semantics=("parallel", "parallel"),
            vmem_limit_bytes=_vmem_limit(pass1_bytes(tm))),
    )(pad_x(m_p), wb)

    # Tiny (C,)-sized BN fold in plain JAX (not the hot path). Padded rows are zero, so
    # dividing by the TRUE n keeps training-mode batch statistics exact.
    mean = jnp.sum(sums, axis=(0, 1)) / n
    var = jnp.maximum(jnp.sum(sqs, axis=(0, 1)) / n - mean * mean, 0.0)
    scale = gamma_p * jax.lax.rsqrt(var + BN_EPS)
    shift = beta_p - mean * scale

    # Pass 2: mem-bound elementwise pass; row tile decoupled from tm — grow it while it
    # divides m_p and fits the VMEM budget (big lane-dense tiles reach ~85% of roofline).
    # (input_output_aliases is not applicable: y is bf16, the output is x.dtype.)
    def pass2_bytes(r):
        return 2 * r * c_p * 2 + 2 * r * c_p * 4 + 4 * c_p * 4
    rows2 = tm
    while m_p % (rows2 * 2) == 0 and pass2_bytes(rows2 * 2) <= _PASS2_VMEM_BUDGET:
        rows2 *= 2

    out_p = pl.pallas_call(
        bn_relu_kernel,
        out_shape=jax.ShapeDtypeStruct((m_p, c_p), x.dtype),
        grid=(m_p // rows2,),
        in_specs=[
            pl.BlockSpec((rows2, c_p), lambda i: (i, 0)),
            pl.BlockSpec((1, c_p), lambda i: (0, 0)),
            pl.BlockSpec((1, c_p), lambda i: (0, 0)),
        ],
        out_specs=pl.BlockSpec((rows2, c_p), lambda i: (i, 0)),
        compiler_params=pltpu.CompilerParams(
            dimension_semantics=("parallel",),
            vmem_limit_bytes=_vmem_limit(pass2_bytes(rows2))),
    )(y, scale.reshape(1, c_p), shift.reshape(1, c_p))

    return out_p[:n, :out_dim]


def linear_bn_relu(x, weight, gamma, beta, *, tile_m=512):
    """One-shot convenience wrapper. For repeated calls with the same weight, call
    prepare_weight(weight) once and use linear_bn_relu_prepared directly."""
    wb = prepare_weight(weight)
    return linear_bn_relu_prepared(x, wb, gamma, beta,
                                   out_dim=weight.shape[0], tile_m=tile_m)


def reference(x, weight, gamma, beta):
    """Pure-JAX mirror of the PyTorch forward (bias-free Linear, training-mode
    BatchNorm1d(eps=1e-3), ReLU) using the same bf16-input / f32-accumulate matmul."""
    y = jnp.dot(x.astype(jnp.bfloat16), weight.T.astype(jnp.bfloat16),
                preferred_element_type=jnp.float32)
    mean = jnp.mean(y, axis=0, keepdims=True)
    var = jnp.mean((y - mean) ** 2, axis=0, keepdims=True)
    y = (y - mean) * jax.lax.rsqrt(var + BN_EPS)
    y = y * gamma[None, :] + beta[None, :]
    return jnp.maximum(y, 0.0)


if __name__ == "__main__":
    # TODO(synk): BatchNorm1d running_mean/running_var (momentum=0.1) buffer updates are
    # training-state side effects, not part of the forward output, so they are not emitted.
    # TODO(synk): the is_bn=False branch (Linear WITH bias, no BN) is not implemented here.
    key = jax.random.PRNGKey(0)

    def run_case(n, in_dim, out_dim, k):
        kx, kw, kg, kb = jax.random.split(k, 4)
        x = jax.random.normal(kx, (n, in_dim), dtype=jnp.float32)
        weight = jax.random.normal(kw, (out_dim, in_dim), dtype=jnp.float32) * 0.1
        gamma = 1.0 + 0.1 * jax.random.normal(kg, (out_dim,), dtype=jnp.float32)
        beta = 0.1 * jax.random.normal(kb, (out_dim,), dtype=jnp.float32)

        out = jax.block_until_ready(linear_bn_relu(x, weight, gamma, beta))
        ref = reference(x, weight, gamma, beta)
        assert out.shape == ref.shape == (n, out_dim)
        max_err = float(jnp.max(jnp.abs(out - ref)))
        # bf16 pre-BN activations between the two passes bound the error at
        # roughly gamma * |y|/std * 2^-9, comfortably inside this tolerance.
        assert jnp.allclose(out, ref, atol=5e-3, rtol=1e-2), (n, in_dim, out_dim, max_err)

    k1, k2 = jax.random.split(key)
    run_case(16, 32, 64, k1)        # module-scale shapes -> fused single-kernel path
    run_case(2048, 512, 768, k2)    # larger shapes      -> tiled two-pass path
    print("KERNEL_OK")
</pallas_src>

<mosaic_0001>
module attributes {stable_mosaic.version = 11 : i64} {
  func.func @fused_kernel(%arg0: i32, %arg1: memref<16x128xf32, #tpu.memory_space<vmem>>, %arg2: memref<128x128xbf16, #tpu.memory_space<vmem>>, %arg3: memref<1x128xf32, #tpu.memory_space<vmem>>, %arg4: memref<1x128xf32, #tpu.memory_space<vmem>>, %arg5: memref<16x128xf32, #tpu.memory_space<vmem>>) attributes {dimension_semantics = [#tpu.dimension_semantics<arbitrary>], iteration_bounds = array<i64: 1>, scalar_prefetch = 0 : i64, scratch_operands = 0 : i64, tpu.core_type = #tpu.core_type<tc>, window_params = [{pipeline_mode = #tpu.pipeline_mode<synchronous>, transform_indices = @transform_0, window_bounds = array<i64: 16, 128>}, {pipeline_mode = #tpu.pipeline_mode<synchronous>, transform_indices = @transform_1, window_bounds = array<i64: 128, 128>}, {pipeline_mode = #tpu.pipeline_mode<synchronous>, transform_indices = @transform_2, window_bounds = array<i64: 1, 128>}, {pipeline_mode = #tpu.pipeline_mode<synchronous>, transform_indices = @transform_3, window_bounds = array<i64: 1, 128>}, {pipeline_mode = #tpu.pipeline_mode<synchronous>, transform_indices = @transform_4, window_bounds = array<i64: 16, 128>}]} {
    %c0 = arith.constant 0 : index
    %c0_0 = arith.constant 0 : index
    %0 = vector.load %arg1[%c0, %c0_0] : memref<16x128xf32, #tpu.memory_space<vmem>>, vector<16x128xf32>
    %1 = arith.truncf %0 : vector<16x128xf32> to vector<16x128xbf16>
    %c0_1 = arith.constant 0 : index
    %c0_2 = arith.constant 0 : index
    %2 = vector.load %arg2[%c0_1, %c0_2] : memref<128x128xbf16, #tpu.memory_space<vmem>>, vector<128x128xbf16>
    %cst = arith.constant dense<0.000000e+00> : vector<16x128xf32>
    %3 = tpu.matmul %1, %2, %cst {dimension_numbers = #tpu.dot_dimension_numbers<[1], [0], [0], [1], [0, 0, 1, 1], [], []>} : vector<16x128xbf16>, vector<128x128xbf16>, vector<16x128xf32> -> vector<16x128xf32>
    %cst_3 = arith.constant dense<0.000000e+00> : vector<128xf32>
    %4 = vector.multi_reduction <add>, %3, %cst_3 [0] : vector<16x128xf32> to vector<128xf32>
    %5 = vector.shape_cast %4 : vector<128xf32> to vector<1x128xf32>
    %cst_4 = arith.constant 6.250000e-02 : f32
    %6 = vector.broadcast %cst_4 : f32 to vector<1x128xf32>
    %7 = arith.mulf %5, %6 : vector<1x128xf32>
    %8 = tpu.iota {dimensions = array<i32: 0>} : vector<16x128xi32>
    %c16_i32 = arith.constant 16 : i32
    %9 = vector.broadcast %c16_i32 : i32 to vector<16x128xi32>
    %10 = arith.cmpi slt, %8, %9 : vector<16x128xi32>
    %11 = vector.broadcast %7 : vector<1x128xf32> to vector<16x128xf32>
    %12 = arith.subf %3, %11 : vector<16x128xf32>
    %cst_5 = arith.constant 0.000000e+00 : f32
    %13 = vector.broadcast %cst_5 : f32 to vector<16x128xf32>
    %14 = arith.select %10, %12, %13 : vector<16x128xi1>, vector<16x128xf32>
    %15 = arith.mulf %14, %14 : vector<16x128xf32>
    %cst_6 = arith.constant dense<0.000000e+00> : vector<128xf32>
    %16 = vector.multi_reduction <add>, %15, %cst_6 [0] : vector<16x128xf32> to vector<128xf32>
    %17 = vector.shape_cast %16 : vector<128xf32> to vector<1x128xf32>
    %cst_7 = arith.constant 6.250000e-02 : f32
    %18 = vector.broadcast %cst_7 : f32 to vector<1x128xf32>
    %19 = arith.mulf %17, %18 : vector<1x128xf32>
    %c0_8 = arith.constant 0 : index
    %c0_9 = arith.constant 0 : index
    %20 = vector.load %arg3[%c0_8, %c0_9] : memref<1x128xf32, #tpu.memory_space<vmem>>, vector<1x128xf32>
    %cst_10 = arith.constant 1.000000e-03 : f32
    %21 = vector.broadcast %cst_10 : f32 to vector<1x128xf32>
    %22 = arith.addf %19, %21 : vector<1x128xf32>
    %23 = math.rsqrt %22 : vector<1x128xf32>
    %24 = arith.mulf %20, %23 : vector<1x128xf32>
    %c0_11 = arith.constant 0 : index
    %c0_12 = arith.constant 0 : index
    %25 = vector.load %arg4[%c0_11, %c0_12] : memref<1x128xf32, #tpu.memory_space<vmem>>, vector<1x128xf32>
    %26 = arith.mulf %7, %24 : vector<1x128xf32>
    %27 = arith.subf %25, %26 : vector<1x128xf32>
    %28 = vector.broadcast %24 : vector<1x128xf32> to vector<16x128xf32>
    %29 = arith.mulf %3, %28 : vector<16x128xf32>
    %30 = vector.broadcast %27 : vector<1x128xf32> to vector<16x128xf32>
    %31 = arith.addf %29, %30 : vector<16x128xf32>
    %cst_13 = arith.constant 0.000000e+00 : f32
    %32 = vector.broadcast %cst_13 : f32 to vector<16x128xf32>
    %33 = arith.maximumf %31, %32 : vector<16x128xf32>
    %c0_14 = arith.constant 0 : index
    %c0_15 = arith.constant 0 : index
    %34 = vector.load %arg5[%c0_14, %c0_15] : memref<16x128xf32, #tpu.memory_space<vmem>>, vector<16x128xf32>
    tpu.vector_store %arg5[%c0_14, %c0_15], %33 {strides = array<i32>} : memref<16x128xf32, #tpu.memory_space<vmem>>, vector<16x128xf32>,
    return
  }
  func.func @transform_0(%arg0: i32) -> (i32, i32) {
    %c0_i32 = arith.constant 0 : i32
    %c0_i32_0 = arith.constant 0 : i32
    %c0_i32_1 = arith.constant 0 : i32
    return %c0_i32, %c0_i32_0 : i32, i32
  }
  func.func @transform_1(%arg0: i32) -> (i32, i32) {
    %c0_i32 = arith.constant 0 : i32
    %c0_i32_0 = arith.constant 0 : i32
    %c0_i32_1 = arith.constant 0 : i32
    return %c0_i32, %c0_i32_0 : i32, i32
  }
  func.func @transform_2(%arg0: i32) -> (i32, i32) {
    %c0_i32 = arith.constant 0 : i32
    %c0_i32_0 = arith.constant 0 : i32
    %c0_i32_1 = arith.constant 0 : i32
    return %c0_i32, %c0_i32_0 : i32, i32
  }
  func.func @transform_3(%arg0: i32) -> (i32, i32) {
    %c0_i32 = arith.constant 0 : i32
    %c0_i32_0 = arith.constant 0 : i32
    %c0_i32_1 = arith.constant 0 : i32
    return %c0_i32, %c0_i32_0 : i32, i32
  }
  func.func @transform_4(%arg0: i32) -> (i32, i32) {
    %c0_i32 = arith.constant 0 : i32
    %c0_i32_0 = arith.constant 0 : i32
    %c0_i32_1 = arith.constant 0 : i32
    return %c0_i32, %c0_i32_0 : i32, i32
  }
}

</mosaic_0001>

<bundles_post_ra>
// kernel: linear_bn_relu_prepared.1
= control target key start
LH: loop header
LB: loop body
LE: loop exit
PB: predicated region body
PF: predicated region fallthrough
CT: control target
= control target key end

     0   :  { %v271_v1 = vmov 0.0   ;;  %vm272_vm0 = vmmov 0   ;;  %s340_s0 = inlined_call_operand.vmem [shape: f32[16,128], index: 0, kind: input, shape index: {}]   ;;  %s341_s1 = inlined_call_operand.vmem [shape: bf16[128,128], index: 1, kind: input, shape index: {}]   ;;  %s342_s2 = inlined_call_operand.vmem [shape: f32[1,128], index: 2, kind: input, shape index: {}]   ;;  %s343_s3 = inlined_call_operand.vmem [shape: f32[1,128], index: 3, kind: input, shape index: {}]   ;;  %s344_s4 = inlined_call_operand.hbm [shape: f32[16,128], index: 4, kind: output, shape index: {}]  }
   0x1   :  { %v239_v0 = vld [vmem:[%s341_s1 + $0x38] sm:$0xff]   ;;  %214 = vmatprep.subr.bf16.mxu0 %v271_v1  ;;  %v240_v2 = vld [vmem:[%s341_s1 + $0x30] sm:$0xff]   ;;  %230 = vmatprep.mubr.msk.bf16.mxu0 %vm272_vm0, %v271_v1  ;;  %v241_v3 = vld [vmem:[%s341_s1 + $0x28] sm:$0xff]  }
   0x2   :  { %215 = vmatpush3.bf16.msra.mxu0 %v239_v0 }
   0x3   :  { %216 = vmatprep.subr.bf16.mxu0 %v271_v1 }
   0x6   :  { %217 = vmatpush3.bf16.msra.mxu0 %v240_v2 }
   0x7   :  { %218 = vmatprep.subr.bf16.mxu0 %v271_v1 }
   0x8   :  { %9 = vsyncpa [#allocation3], 0  ;;  %v242_v4 = vld [vmem:[%s341_s1 + $0x20] sm:$0xff]   ;;  %v243_v5 = vld [vmem:[%s341_s1 + $0x18] sm:$0xff]   ;;  %v162_v37 = vlaneseq  ;;  %s273_s11 = smov [#allocation2]  }
   0x9   :  { %v244_v6 = vld [vmem:[%s341_s1 + $0x10] sm:$0xff]   ;;  %v245_v7 = vld [vmem:[%s341_s1 + $0x8] sm:$0xff]   ;;  %v246_v8 = vld [vmem:[%s341_s1] sm:$0xff]   ;;  %s186_s12 = sshll.u32 %s273_s11, 4  ;;  %s187_s12 = int_to_ptr.vmem [resolvable:$true] %s186_s12 }
   0xa   :  { %219 = vmatpush3.bf16.msra.mxu0 %v241_v3  ;;  %v19_v9 = vld [vmem:[%s340_s0] sm:$0xff]  ;;  %v20_v10 = vld [vmem:[%s340_s0 + $0x8] sm:$0xff]  ;;  %v163_v38 = vshrl.u32 %v162_v37, 7  ;;  %p254_p1 = scmp.lt.s32.totalorder %s187_s12, %s187_s12 }
   0xb   :  { %220 = vmatprep.subr.bf16.mxu0 %v271_v1  ;;  %v21_v11 = vpack.c.bf16 %v20_v10, %v19_v9  ;;  %v154_v39 = vld [vmem:[%s342_s2] sm:$0x1]  ;;  %s249_s2 = scalar_lea.vmem %s187_s12, 256 }
   0xc   :  { %v164_v40 = vsub.s32 0, %v163_v38  ;;  %v158_v43 = vld [vmem:[%s343_s3] sm:$0x1]  ;;  %p250_p0 = scmp.ne.s32.totalorder %s187_s12, %s249_s2  ;;  %p255_p2 = scmp.lt.s32.totalorder %s249_s2, %s249_s2 }
   0xe   :  { %221 = vmatpush3.bf16.msra.mxu0 %v242_v4  ;;  %p256_p3 = por %p255_p2, %p254_p1 }
   0xf   :  { %222 = vmatprep.subr.bf16.mxu0 %v271_v1 }
  0x10   :  { %p257_p4 = pnand %p256_p3, %p250_p0 }
  0x12   :  { %223 = vmatpush3.bf16.msra.mxu0 %v243_v5 }
  0x13   :  { %224 = vmatprep.subr.bf16.mxu0 %v271_v1 }
  0x16   :  { %225 = vmatpush3.bf16.msra.mxu0 %v244_v6 }
  0x17   :  { %226 = vmatprep.subr.bf16.mxu0 %v271_v1 }
  0x1a   :  { %227 = vmatpush3.bf16.msra.mxu0 %v245_v7 }
  0x1b   :  { %228 = vmatprep.subr.bf16.mxu0 %v271_v1 }
  0x1e   :  { %229 = vmatpush3.bf16.msra.mxu0 %v246_v8 }
  0x21   :  { %231 = vmatmul.mubr.bf16.vlgmr.msra.gmra.mxu0 %v21_v11 }
  0xe1   :  { %v120_v12 = vpop.f32.mrf.mxu0 }
  0xe3   :  { %v232_v13 = vpop.f32.mrf.mxu0 }
  0xe5   :  { %v123_v14 = vpop.f32.mrf.mxu0 }
  0xe6   :  { %v127_v15 = vadd.f32 %v123_v14, %v120_v12 }
  0xe7   :  { %v233_v16 = vpop.f32.mrf.mxu0 }
  0xe8   :  { %v128_v17 = vrot.slane %v127_v15, 4 }
  0xea   :  { %v129_v18 = vadd.f32 %v128_v17, %v127_v15 }
  0xec   :  { %v130_v19 = vrot.slane %v129_v18, 2 }
  0xee   :  { %v131_v20 = vadd.f32 %v130_v19, %v129_v18 }
  0xf0   :  { %v132_v21 = vrot.slane %v131_v20, 1 }
  0xf2   :  { %v133_v22 = vadd.f32 %v132_v21, %v131_v20 }
  0xf4   :  { %v134_v23 = vmul.f32 0.0625, %v133_v22 }
  0xf6   :  { %v140_v24 = vsub.f32 %v120_v12, %v134_v23  ;;  %v141_v25 = vsub.f32 %v123_v14, %v134_v23 }
  0xf8   :  { %v144_v26 = vmul.f32 %v140_v24, %v140_v24  ;;  %v145_v27 = vmul.f32 %v141_v25, %v141_v25 }
  0xfa   :  { %v146_v28 = vadd.f32 %v145_v27, %v144_v26 }
  0xfc   :  { %v147_v29 = vrot.slane %v146_v28, 4 }
  0xfe   :  { %v148_v30 = vadd.f32 %v147_v29, %v146_v28 }
 0x100   :  { %v149_v31 = vrot.slane %v148_v30, 2 }
 0x102   :  { %v150_v32 = vadd.f32 %v149_v31, %v148_v30 }
 0x104   :  { %v151_v33 = vrot.slane %v150_v32, 1 }
 0x106   :  { %v152_v34 = vadd.f32 %v151_v33, %v150_v32 }
 0x108   :  { %v153_v35 = vmul.f32 0.0625, %v152_v34 }
 0x10a   :  { %v155_v36 = vadd.f32 0.001, %v153_v35 }
 0x10c   :  { %247 = vrsqrt.f32 %v155_v36 }
 0x119   :  { %v248_v41 = vpop.eup %247 }
 0x11a   :  { %v157_v42 = vmul.f32 %v248_v41, %v154_v39 }
 0x11c   :  { %v159_v44 = vmul.f32 %v157_v42, %v134_v23  ;;  %v165_v45 = vrot.slane %v157_v42, %v164_v40 }
 0x11e   :  { %v160_v46 = vsub.f32 %v158_v43, %v159_v44  ;;  %v167_v47 = vmul.f32 %v165_v45, %v120_v12  ;;  %v168_v48 = vmul.f32 %v165_v45, %v123_v14 }
 0x120   :  { %v173_v49 = vrot.slane %v160_v46, %v164_v40 }
 0x122   :  { %v176_v50 = vadd.f32 %v173_v49, %v168_v48  ;;  %v175_v51 = vadd.f32 %v173_v49, %v167_v47 }
 0x124   :  { %v178_v52 = vmax.f32 %v176_v50, 0.0  ;;  %v177_v53 = vmax.f32 %v175_v51, 0.0 }
 0x126   :  { %180 = vst [vmem:[#allocation2 + $0x8] sm:$0xff] %v178_v52  ;;  %179 = vst [vmem:[#allocation2] sm:$0xff] %v177_v53 }
 0x127   :  { %260 = shalt.err (!%p257_p4)
}
 0x128   :  { %s274_s3 = smov 128   ;;  %s275_s13 = smov 8  }
 0x129   :  { %192 = dma.vmem_to_hbm [thread:$0]  %s187_s12, 256, %s344_s4, [#allocation3], %s274_s3, %s274_s3, %s275_s13  }
 0x12a   :  { %269 = dma.done.wait [#allocation3], 256  }
 0x12b   :  { %270 = vsyncadd [#allocation3], 4294967040 }
 0x12c   :  { %196 = vsyncpa [#allocation3], 1 }

</bundles_post_ra>
